<compile_context>
chip_gen: v7x
topology: tpu7x:2x2x1
jax: 0.10.0
libtpu: 0.0.40
codegen_flags: <defaults>
</compile_context>

<pallas_src>
import functools
import math

import jax
import jax.numpy as jnp
from jax.experimental import pallas as pl
from jax.experimental.pallas import tpu as pltpu


# ---------------------------------------------------------------------------
# VMEM budget (generation-aware)
# ---------------------------------------------------------------------------
@functools.lru_cache(maxsize=1)
def _vmem_limit():
    """~85% of physical VMEM: fits v5e/v6e (128 MiB) and v7x (64 MiB) with headroom."""
    try:
        cap = pltpu.get_tpu_info().vmem_capacity_bytes
    except Exception:
        cap = 64 * 1024 * 1024  # conservative fallback (v7x per-TC VMEM)
    return int(cap * 0.85)


def _pick_tile(dim, target):
    """MXU/lane-friendly tile that divides `dim`, else the full dim."""
    for t in (target, 256, 128):
        if dim % t == 0:
            return t
    return dim


# ---------------------------------------------------------------------------
# Tiled batched linear:  y[n] = W @ x[n] + b    (W in PyTorch (Nout, K) layout)
# ---------------------------------------------------------------------------
def _linear_fullk_kernel(w_ref, x_ref, b_ref, o_ref):
    # w: (tn, K) bf16, x: (1, K, tl), b: (tn, 1) f32, o: (1, tn, tl)
    acc = jnp.dot(
        w_ref[...], x_ref[0].astype(jnp.bfloat16), preferred_element_type=jnp.float32
    )
    o_ref[0] = (acc + b_ref[...]).astype(o_ref.dtype)


def _linear_ktiled_kernel(w_ref, x_ref, b_ref, o_ref, acc_ref):
    # w: (tn, tk) bf16, x: (1, tk, tl), b: (tn, 1) f32, o: (1, tn, tl)
    @pl.when(pl.program_id(3) == 0)
    def _():
        acc_ref[...] = jnp.zeros_like(acc_ref)

    acc_ref[...] += jnp.dot(
        w_ref[...], x_ref[0].astype(jnp.bfloat16), preferred_element_type=jnp.float32
    )

    @pl.when(pl.program_id(3) == pl.num_programs(3) - 1)
    def _():
        o_ref[0] = (acc_ref[...] + b_ref[...]).astype(o_ref.dtype)


def pallas_batched_linear(x, w, b, *, out_dtype=jnp.float32, tn=512, tl=512, tk=512):
    """x: (B, K, L), w: (Nout, K), b: (Nout,)  ->  (B, Nout, L) = w @ x + b."""
    B, K, L = x.shape
    Nout = w.shape[0]
    tn = _pick_tile(Nout, tn)
    tl = _pick_tile(L, tl)

    w_bf = w.astype(jnp.bfloat16)                       # tiny one-time cast
    b_col = b.reshape(Nout, 1).astype(jnp.float32)
    out_shape = jax.ShapeDtypeStruct((B, Nout, L), out_dtype)
    out_item = jnp.dtype(out_dtype).itemsize

    # Full-K path: no accumulator scratch, no reduction grid axis.
    fullk_bytes = 2 * (2 * tn * K + x.dtype.itemsize * K * tl + out_item * tn * tl)
    if fullk_bytes <= _vmem_limit() // 2:
        return pl.pallas_call(
            _linear_fullk_kernel,
            out_shape=out_shape,
            grid=(B, Nout // tn, L // tl),
            in_specs=[
                pl.BlockSpec((tn, K), lambda n, i, j: (i, 0)),        # weights (bf16)
                pl.BlockSpec((1, K, tl), lambda n, i, j: (n, 0, j)),  # activations
                pl.BlockSpec((tn, 1), lambda n, i, j: (i, 0)),        # bias
            ],
            out_specs=pl.BlockSpec((1, tn, tl), lambda n, i, j: (n, i, j)),
            compiler_params=pltpu.CompilerParams(
                dimension_semantics=("parallel", "parallel", "parallel"),
                vmem_limit_bytes=_vmem_limit(),
            ),
        )(w_bf, x, b_col)

    tk = _pick_tile(K, tk)
    return pl.pallas_call(
        _linear_ktiled_kernel,
        out_shape=out_shape,
        grid=(B, Nout // tn, L // tl, K // tk),
        in_specs=[
            pl.BlockSpec((tn, tk), lambda n, i, j, k: (i, k)),
            pl.BlockSpec((1, tk, tl), lambda n, i, j, k: (n, k, j)),
            pl.BlockSpec((tn, 1), lambda n, i, j, k: (i, 0)),
        ],
        out_specs=pl.BlockSpec((1, tn, tl), lambda n, i, j, k: (n, i, j)),
        scratch_shapes=[pltpu.VMEM((tn, tl), jnp.float32)],
        compiler_params=pltpu.CompilerParams(
            dimension_semantics=("parallel", "parallel", "parallel", "arbitrary"),
            vmem_limit_bytes=_vmem_limit(),
        ),
    )(w_bf, x, b_col)


# ---------------------------------------------------------------------------
# Attention kernel: `hb` heads + one query tile per grid step,
# in-kernel head-averaged attention weights (resident (tLq, L) block over hg)
# ---------------------------------------------------------------------------
def _attn_kernel(q_ref, k_ref, v_ref, o_ref, w_ref, *, hb, head_dim, n_head, scale):
    # q/o blocks: (1, hb*Dh, tLq); k/v blocks: (1, hb*Dh, L); w block: (1, tLq, L)
    hg = pl.program_id(2)

    kb = k_ref[0].astype(jnp.bfloat16)
    vb = v_ref[0].astype(jnp.bfloat16)

    @pl.when(hg == 0)
    def _():
        w_ref[...] = jnp.zeros_like(w_ref)

    w_acc = jnp.zeros(w_ref.shape[1:], jnp.float32)
    for h in range(hb):                      # static unrolled loop over the head group
        lo = h * head_dim
        hi = lo + head_dim
        # fold softmax scale into the small (Dh, tLq) query tile (not the (tLq, L) scores)
        qh = (q_ref[0, lo:hi, :].astype(jnp.float32) * scale).astype(jnp.bfloat16)
        kh = kb[lo:hi, :]                    # (Dh, L)
        vh = vb[lo:hi, :]                    # (Dh, L)

        # s[i, j] = sum_d q[d, i] * k[d, j]   ("trans_a" matmul, no .T)
        s = jax.lax.dot_general(
            qh, kh, (((0,), (0,)), ((), ())), preferred_element_type=jnp.float32
        )                                                            # (tLq, L) f32

        # numerically stable softmax in f32; EXACT normalization (weights are returned)
        m = jnp.max(s, axis=-1, keepdims=True)
        p = jnp.exp(s - m)
        denom = jnp.sum(p, axis=-1, keepdims=True)
        w = p * (1.0 / denom)                                        # (tLq, L) f32
        w_acc = w_acc + w

        # o[d, i] = sum_j v[d, j] * w[i, j]   ("trans_b" matmul, no .T)
        o = jax.lax.dot_general(
            vh, w.astype(jnp.bfloat16), (((1,), (1,)), ((), ())),
            preferred_element_type=jnp.float32,
        )                                                            # (Dh, tLq) f32
        o_ref[0, lo:hi, :] = o.astype(o_ref.dtype)                   # direct per-head store

    # resident accumulation across the head-group (reduction) grid axis
    w_ref[0] += w_acc

    @pl.when(hg == pl.num_programs(2) - 1)
    def _():
        w_ref[0] *= 1.0 / n_head             # apply 1/n_head once, on the last hg step


def _attn_tiles(n_head, head_dim, seq_len, budget_bytes):
    """Pick (heads-per-step, query-tile) fitting the VMEM budget."""
    if seq_len % 128 == 0:
        lq_cands = [d for d in range(seq_len, 0, -1)
                    if seq_len % d == 0 and d % 128 == 0 and d <= 1024]
        lq_cands = lq_cands or [seq_len]
    else:
        lq_cands = [seq_len]
    hb_cands = [d for d in range(n_head, 0, -1)
                if n_head % d == 0 and (d * head_dim) % 8 == 0]
    hb_cands = hb_cands or [n_head]

    def est(hb, tlq):
        hpb = hb * head_dim
        return (4 * hpb * tlq              # q block  (bf16, double-buffered)
                + 8 * hpb * seq_len        # k+v blocks (bf16, double-buffered)
                + 4 * hpb * tlq            # o block  (bf16, double-buffered)
                + 8 * tlq * seq_len        # resident averaged-weights block (f32, 2 bufs)
                + 16 * tlq * seq_len)      # s/p/w/acc f32 temporaries

    for hb in hb_cands:
        for tlq in lq_cands:
            if est(hb, tlq) <= budget_bytes:
                return hb, tlq
    return hb_cands[-1], lq_cands[-1]


def pallas_attention(qkv, *, n_head, head_dim):
    """qkv: (N, 3E, L) fused projection (q | k | v, head-major channels).

    Returns:
      o      : (N, E, L) bf16 attention output (head-major channel layout)
      attn_w : (N, L, L) f32 head-averaged attention weights
    """
    N, threeE, L = qkv.shape
    E = threeE // 3
    assert E == n_head * head_dim

    hb, tlq = _attn_tiles(n_head, head_dim, L, int(0.7 * _vmem_limit()))
    hpb = hb * head_dim
    assert hpb % 8 == 0, "hb * head_dim must be a multiple of 8 (sublane tiling)"
    n_hg = n_head // hb
    n_lq = L // tlq
    scale = 1.0 / math.sqrt(head_dim)

    kernel = functools.partial(
        _attn_kernel, hb=hb, head_dim=head_dim, n_head=n_head, scale=scale
    )

    # q / k / v windows are just different block offsets into the same qkv buffer.
    q_spec = pl.BlockSpec((1, hpb, tlq), lambda n, lq, hg: (n, hg, lq))
    k_spec = pl.BlockSpec((1, hpb, L), lambda n, lq, hg: (n, n_hg + hg, 0))
    v_spec = pl.BlockSpec((1, hpb, L), lambda n, lq, hg: (n, 2 * n_hg + hg, 0))

    o, attn_w = pl.pallas_call(
        kernel,
        out_shape=(
            jax.ShapeDtypeStruct((N, E, L), jnp.bfloat16),
            jax.ShapeDtypeStruct((N, L, L), jnp.float32),
        ),
        grid=(N, n_lq, n_hg),
        in_specs=[q_spec, k_spec, v_spec],
        out_specs=(
            pl.BlockSpec((1, hpb, tlq), lambda n, lq, hg: (n, hg, lq)),
            pl.BlockSpec((1, tlq, L), lambda n, lq, hg: (n, lq, 0)),  # resident over hg
        ),
        compiler_params=pltpu.CompilerParams(
            dimension_semantics=("parallel", "parallel", "arbitrary"),
            vmem_limit_bytes=_vmem_limit(),
        ),
    )(qkv, qkv, qkv)
    return o, attn_w


# ---------------------------------------------------------------------------
# Module wrapper (parameters + forward)
# ---------------------------------------------------------------------------
class AttentionPallas:
    """Pallas equivalent of the PyTorch Attention module (MultiheadAttention self-attn)."""

    def __init__(self, n_embd, n_head, key):
        assert n_embd % n_head == 0
        self.n_embd = n_embd
        self.n_head = n_head
        self.head_dim = n_embd // n_head

        k1, k2, k3, k4 = jax.random.split(key, 4)
        scale_in = 1.0 / math.sqrt(n_embd)
        # nn.MultiheadAttention parameter shapes (PyTorch (Nout, K) weight layout).
        self.in_proj_w = jax.random.uniform(
            k1, (3 * n_embd, n_embd), jnp.float32, -scale_in, scale_in
        )
        self.in_proj_b = jax.random.uniform(
            k2, (3 * n_embd,), jnp.float32, -scale_in, scale_in
        )
        self.out_proj_w = jax.random.uniform(
            k3, (n_embd, n_embd), jnp.float32, -scale_in, scale_in
        )
        self.out_proj_b = jax.random.uniform(
            k4, (n_embd,), jnp.float32, -scale_in, scale_in
        )

    def __call__(self, x):
        # x: (N, E, L) — the PyTorch forward's permute(2,0,1)/permute(1,2,0) round-trip
        # is folded into the kernels' layout, so no wrapper transposes are needed.
        N, E, L = x.shape
        assert E == self.n_embd

        # fused in-projection: (N, 3E, L) kept in bf16 (halves HBM traffic downstream)
        qkv = pallas_batched_linear(
            x, self.in_proj_w, self.in_proj_b, out_dtype=jnp.bfloat16
        )

        # multi-head attention + in-kernel head-averaged weights
        o, attn_w = pallas_attention(
            qkv, n_head=self.n_head, head_dim=self.head_dim
        )  # (N, E, L) bf16, (N, L, L) f32

        # out-projection directly produces the module's (N, E, L) f32 output layout
        out = pallas_batched_linear(
            o, self.out_proj_w, self.out_proj_b, out_dtype=jnp.float32
        )
        return out, attn_w


# ---------------------------------------------------------------------------
# Demo
# ---------------------------------------------------------------------------
if __name__ == "__main__":
    key = jax.random.PRNGKey(0)
    k_param, k_x = jax.random.split(key)

    batch, n_embd, n_head, seq = 2, 32, 4, 8
    x = jax.random.normal(k_x, (batch, n_embd, seq), jnp.float32)

    attn = AttentionPallas(n_embd, n_head, k_param)
    out, attn_w = attn(x)
    jax.block_until_ready((out, attn_w))

    assert out.shape == (batch, n_embd, seq)
    assert attn_w.shape == (batch, seq, seq)
    # rows of the head-averaged softmax weights sum to 1 (exact f32 normalization)
    assert jnp.allclose(jnp.sum(attn_w, axis=-1), 1.0, atol=1e-3)
    assert bool(jnp.all(jnp.isfinite(out)))
    assert bool(jnp.all(jnp.isfinite(attn_w)))

    print("KERNEL_OK")
</pallas_src>

<mosaic_0001>
module attributes {stable_mosaic.version = 11 : i64} {
  func.func @_linear_fullk_kernel(%arg0: i32, %arg1: i32, %arg2: i32, %arg3: memref<96x32xbf16, #tpu.memory_space<vmem>>, %arg4: memref<1x32x8xf32, #tpu.memory_space<vmem>>, %arg5: memref<96x1xf32, #tpu.memory_space<vmem>>, %arg6: memref<1x96x8xbf16, #tpu.memory_space<vmem>>) attributes {dimension_semantics = [#tpu.dimension_semantics<parallel>, #tpu.dimension_semantics<parallel>, #tpu.dimension_semantics<parallel>], iteration_bounds = array<i64: 2, 1, 1>, scalar_prefetch = 0 : i64, scratch_operands = 0 : i64, tpu.core_type = #tpu.core_type<tc>, window_params = [{transform_indices = @transform_0, window_bounds = array<i64: 96, 32>}, {transform_indices = @transform_1, window_bounds = array<i64: 1, 32, 8>}, {transform_indices = @transform_2, window_bounds = array<i64: 96, 1>}, {transform_indices = @transform_3, window_bounds = array<i64: 1, 96, 8>}]} {
    %c0 = arith.constant 0 : index
    %c0_0 = arith.constant 0 : index
    %0 = vector.load %arg3[%c0, %c0_0] : memref<96x32xbf16, #tpu.memory_space<vmem>>, vector<96x32xbf16>
    %c0_1 = arith.constant 0 : index
    %c0_2 = arith.constant 0 : index
    %c0_3 = arith.constant 0 : index
    %1 = vector.load %arg4[%c0_1, %c0_2, %c0_3] : memref<1x32x8xf32, #tpu.memory_space<vmem>>, vector<1x32x8xf32>
    %2 = vector.shape_cast %1 : vector<1x32x8xf32> to vector<32x8xf32>
    %3 = arith.truncf %2 : vector<32x8xf32> to vector<32x8xbf16>
    %cst = arith.constant dense<0.000000e+00> : vector<96x8xf32>
    %4 = tpu.matmul %0, %3, %cst {dimension_numbers = #tpu.dot_dimension_numbers<[1], [0], [0], [1], [0, 0, 1, 1], [], []>} : vector<96x32xbf16>, vector<32x8xbf16>, vector<96x8xf32> -> vector<96x8xf32>
    %c0_4 = arith.constant 0 : index
    %c0_5 = arith.constant 0 : index
    %5 = vector.load %arg5[%c0_4, %c0_5] : memref<96x1xf32, #tpu.memory_space<vmem>>, vector<96x1xf32>
    %6 = vector.broadcast %5 : vector<96x1xf32> to vector<96x8xf32>
    %7 = arith.addf %4, %6 : vector<96x8xf32>
    %8 = arith.truncf %7 : vector<96x8xf32> to vector<96x8xbf16>
    %c0_6 = arith.constant 0 : index
    %c0_7 = arith.constant 0 : index
    %c0_8 = arith.constant 0 : index
    %9 = vector.load %arg6[%c0_6, %c0_7, %c0_8] : memref<1x96x8xbf16, #tpu.memory_space<vmem>>, vector<1x96x8xbf16>
    %10 = vector.shape_cast %9 : vector<1x96x8xbf16> to vector<96x8xbf16>
    %11 = vector.shape_cast %8 : vector<96x8xbf16> to vector<1x96x8xbf16>
    tpu.vector_store %arg6[%c0_6, %c0_7, %c0_8], %11 {strides = array<i32>} : memref<1x96x8xbf16, #tpu.memory_space<vmem>>, vector<1x96x8xbf16>,
    return
  }
  func.func @transform_0(%arg0: i32, %arg1: i32, %arg2: i32) -> (i32, i32) {
    %c0_i32 = arith.constant 0 : i32
    %c0_i32_0 = arith.constant 0 : i32
    return %arg1, %c0_i32 : i32, i32
  }
  func.func @transform_1(%arg0: i32, %arg1: i32, %arg2: i32) -> (i32, i32, i32) {
    %c0_i32 = arith.constant 0 : i32
    %c0_i32_0 = arith.constant 0 : i32
    return %arg0, %c0_i32, %arg2 : i32, i32, i32
  }
  func.func @transform_2(%arg0: i32, %arg1: i32, %arg2: i32) -> (i32, i32) {
    %c0_i32 = arith.constant 0 : i32
    %c0_i32_0 = arith.constant 0 : i32
    return %arg1, %c0_i32 : i32, i32
  }
  func.func @transform_3(%arg0: i32, %arg1: i32, %arg2: i32) -> (i32, i32, i32) {
    %c0_i32 = arith.constant 0 : i32
    return %arg0, %arg1, %arg2 : i32, i32, i32
  }
}

</mosaic_0001>

<bundles_post_ra>
// kernel: tpu_custom_call.1
= control target key start
LH: loop header
LB: loop body
LE: loop exit
PB: predicated region body
PF: predicated region fallthrough
CT: control target
= control target key end

     0   :  { %s832_s12 = smov 0   ;;  %s834_s13 = smov 0   ;;  %s955_s0 = inlined_call_operand.vmem [shape: bf16[96,32], index: 0, kind: input, shape index: {}]   ;;  %s956_s1 = inlined_call_operand.vmem [shape: f32[2,32,8], index: 1, kind: input, shape index: {}]   ;;  %s957_s2 = inlined_call_operand.vmem [shape: f32[96,1], index: 2, kind: input, shape index: {}]   ;;  %s958_s3 = inlined_call_operand.vmem [shape: bf16[2,96,8], index: 3, kind: output, shape index: {}]  }
   0x1   :  { %s836_s14 = smov 0  }
   0x2 LB: > { %s32_s15 = sadd.s32 1, %s805_s13  ;;  %p682_p0 = scmp.ge.s32.totalorder %s809_s14, 1  ;;  %s809_s14 = sphi %s836_s14, %s13_s14   ;;  %s805_s13 = sphi %s834_s13, %s960_s13   ;;  %s801_s12 = sphi %s832_s12, %s959_s12  }
   0x3   : > { %p34_p1 = scmp.ge.s32.totalorder %s32_s15, 2  ;;  %p187_p2 = scmp.lt.s32.totalorder %s809_s14, 3 }
   0x5   : > { %s962_s15 = smov (%p34_p1, %s32_s15), 0  ;;  %p188_p3 = pnand %p682_p0, %p187_p2 }
   0x6   : > { %p237_p4 = scmp.lt.s32.totalorder (!%p188_p3), %s801_s12, 1  ;;  %v781_v0 = vld [vmem:[%s955_s0] sm:$0xff] (!%p188_p3)   ;;  %vm385_vm0 = vcmask (!%p188_p3), 261120   ;;  %v782_v1 = vld [vmem:[%s955_s0 + $0x10] sm:$0xff] (!%p188_p3)   ;;  %v811_v2 = vmov (!%p188_p3), 0   ;;  %v286_v11 = vld [vmem:[%s957_s2 + $0x18] sm:$0xff] (!%p188_p3) }
   0x7   : > { %191 = sbr.rel (%p188_p3) target bundleno = 256 (0x100), region = 32  ;;  %737 = vmatprep.mubr.msk.bf16.mxu0 (!%p188_p3), %vm385_vm0, %v781_v0  ;;  %741 = vmatprep.mubr.msk.bf16.mxu1 (!%p188_p3), %vm385_vm0, %v782_v1  ;;  %v285_v8 = vld [vmem:[%s957_s2 + $0x10] sm:$0xff] (!%p188_p3)  ;;  %v283_v10 = vld [vmem:[%s957_s2] sm:$0xff] (!%p188_p3)  ;;  %v783_v12 = vld [vmem:[%s955_s0 + $0x8] sm:$0xff] (!%p188_p3)   ;;  %vm533_vm1 = vcmask (!%p188_p3), 60416  }
   0x8   : > { %780 = vset.pattern.permute.xlu1 (!%p188_p3), %v811_v2  ;;  %779 = vset.pattern.permute.xlu0 (!%p188_p3), %v811_v2  ;;  %v784_v13 = vld [vmem:[%s955_s0 + $0x18] sm:$0xff] (!%p188_p3)   ;;  %v284_v14 = vld [vmem:[%s957_s2 + $0x8] sm:$0xff] (!%p188_p3)  ;;  %v785_v16 = vld [vmem:[%s955_s0 + $0x20] sm:$0xff] (!%p188_p3)  }
   0x9   : > { %307 = vperm.xlu1 (!%p188_p3), %780, %v285_v8   ;;  %297 = vperm.xlu0 (!%p188_p3), %779, %v283_v10   ;;  %v288_v15 = vld [vmem:[%s957_s2 + $0x28] sm:$0xff] (!%p188_p3)  ;;  %v287_v17 = vld [vmem:[%s957_s2 + $0x20] sm:$0xff] (!%p188_p3)  ;;  %v290_v18 = vld [vmem:[%s957_s2 + $0x38] sm:$0xff] (!%p188_p3) }
   0xa   : > { %v786_v19 = vld [vmem:[%s955_s0 + $0x28] sm:$0xff] (!%p188_p3)   ;;  %v289_v20 = vld [vmem:[%s957_s2 + $0x30] sm:$0xff] (!%p188_p3)  ;;  %v291_v22 = vld [vmem:[%s957_s2 + $0x40] sm:$0xff] (!%p188_p3) }
   0xb   : > { %v292_v21 = vld [vmem:[%s957_s2 + $0x48] sm:$0xff] (!%p188_p3)  ;;  %v294_v23 = vld [vmem:[%s957_s2 + $0x58] sm:$0xff] (!%p188_p3)  ;;  %v293_v24 = vld [vmem:[%s957_s2 + $0x50] sm:$0xff] (!%p188_p3) }
   0xd   : > { %312 = vperm.xlu1 (!%p188_p3), %780, %v286_v11   ;;  %302 = vperm.xlu0 (!%p188_p3), %779, %v284_v14  }
   0xe   : > { %s964_s12 = smov (!%p237_p4, %s801_s12), 1 }
   0xf   : > { %s712_s20 = sshll.u32 %s964_s12, 5  ;;  %s753_s6 = smul.u32 48, %s964_s12 }
  0x10   : > { %s244_s23 = scalar_lea.vmem %s956_s1, %s712_s20 }
  0x11   : > { %v277_v3 = vld [vmem:[%s244_s23] sm:$0xff]  ;;  %v278_v4 = vld [vmem:[%s244_s23 + $0x8] sm:$0xff]  ;;  %v279_v5 = vld [vmem:[%s244_s23 + $0x10] sm:$0xff]  ;;  %322 = vperm.xlu1 %780, %v288_v15   ;;  %317 = vperm.xlu0 %779, %v287_v17   ;;  %s920_s9 = scalar_lea.vmem %s958_s3, %s753_s6 }
  0x12   : > { %v281_v6 = vpack.c.bf16 %v278_v4, %v277_v3  ;;  %v280_v7 = vld [vmem:[%s244_s23 + $0x18] sm:$0xff] }
  0x13   : > { %v282_v9 = vpack.c.bf16 %v280_v7, %v279_v5 }
  0x14   : > { %733 = vmatprep.subr.bf16.mxu0 %v281_v6  ;;  %749 = vmatprep.subr.bf16.mxu1 %v281_v6 }
  0x15   : > { %734 = vmatpush3.bf16.msra.mxu0 %v281_v6  ;;  %751 = vmatpush3.bf16.msra.mxu1 %v281_v6 }
  0x16   : > { %735 = vmatprep.subr.bf16.mxu0 %v282_v9  ;;  %750 = vmatprep.subr.bf16.mxu1 %v282_v9 }
  0x17   : > { %332 = vperm.xlu1 %780, %v290_v18   ;;  %327 = vperm.xlu0 %779, %v289_v20  }
  0x19   : > { %736 = vmatpush3.bf16.msra.mxu0 %v282_v9  ;;  %752 = vmatpush3.bf16.msra.mxu1 %v282_v9 }
  0x1b   : > { %342 = vperm.xlu1 %780, %v292_v21   ;;  %337 = vperm.xlu0 %779, %v291_v22  }
  0x1c   : > { %738 = vmatmul.mubr.msk.bf16.vlgmr.msra.gmra.mrb[0].mxu0 %vm385_vm0, %v783_v12  ;;  %742 = vmatmul.mubr.msk.bf16.vlgmr.msra.gmra.mrb[0].mxu1 %vm385_vm0, %v784_v13 }
  0x1d   : > { %745 = vmatprep.mubr.msk.bf16.mxu1 %vm385_vm0, %v785_v16 }
  0x1f   : > { %352 = vperm.xlu1 %780, %v294_v23   ;;  %347 = vperm.xlu0 %779, %v293_v24  }
  0x24   : > { %746 = vmatmul.mubr.msk.bf16.gmra.mrb[4].mxu1 %vm385_vm0, %v786_v19 }
  0x88   : > { %v298_v25 = vpop.permute.xlu0 %297  ;;  %v308_v26 = vpop.permute.xlu1 %307 }
  0x8c   : > { %v303_v27 = vpop.permute.xlu0 %302  ;;  %v313_v28 = vpop.permute.xlu1 %312 }
  0x90   : > { %v318_v29 = vpop.permute.xlu0 %317  ;;  %v323_v30 = vpop.permute.xlu1 %322 }
  0x96   : > { %v328_v31 = vpop.permute.xlu0 %327  ;;  %v333_v32 = vpop.permute.xlu1 %332 }
  0x9a   : > { %v338_v33 = vpop.permute.xlu0 %337  ;;  %v343_v50 = vpop.permute.xlu1 %342 }
  0x9e   : > { %v348_v59 = vpop.permute.xlu0 %347  ;;  %v353_v63 = vpop.permute.xlu1 %352 }
  0xef   : > { %v739_v34 = vpop.f32.mrb[0].mxu0  ;;  %v743_v35 = vpop.f32.mrb[0].mxu1 }
  0xf0   : > { %v447_v36 = vadd.f32 %v739_v34, %v308_v26  ;;  %v463_v37 = vadd.f32 %v743_v35, %v328_v31  ;;  %v438_v38 = vpop.f32.mrb[1].mxu0  ;;  %v454_v39 = vpop.f32.mrb[1].mxu1 }
  0xf1   : > { %v439_v40 = vadd.f32 %v438_v38, %v298_v25  ;;  %v455_v41 = vadd.f32 %v454_v39, %v318_v29  ;;  %v740_v42 = vpop.f32.mrb[2].mxu0  ;;  %v744_v43 = vpop.f32.mrb[2].mxu1 }
  0xf2   : > { %v715_v44 = vpack.c.bf16 %v447_v36, %v447_v36  ;;  %v719_v45 = vpack.c.bf16 %v463_v37, %v463_v37  ;;  %v450_v46 = vadd.f32 %v740_v42, %v313_v28  ;;  %v466_v47 = vadd.f32 %v744_v43, %v333_v32  ;;  %v441_v48 = vpop.f32.mrb[3].mxu0  ;;  %v457_v49 = vpop.f32.mrb[3].mxu1 }
  0xf3   : > { %v713_v51 = vpack.c.bf16 %v439_v40, %v439_v40  ;;  %v717_v52 = vpack.c.bf16 %v455_v41, %v455_v41  ;;  %v442_v53 = vadd.f32 %v441_v48, %v303_v27  ;;  %v458_v54 = vadd.f32 %v457_v49, %v323_v30 }
  0xf4   : > { %536 = vst.msk [vmem:[%s920_s9 + $0x8] sm:$0xf] %vm533_vm1, %v715_v44  ;;  %540 = vst.msk [vmem:[%s920_s9 + $0x18] sm:$0xf] %vm533_vm1, %v719_v45  ;;  %v716_v55 = vpack.c.bf16 %v450_v46, %v450_v46  ;;  %v720_v56 = vpack.c.bf16 %v466_v47, %v466_v47 }
  0xf5   : > { %534 = vst.msk [vmem:[%s920_s9] sm:$0xf] %vm533_vm1, %v713_v51  ;;  %538 = vst.msk [vmem:[%s920_s9 + $0x10] sm:$0xf] %vm533_vm1, %v717_v52  ;;  %v714_v57 = vpack.c.bf16 %v442_v53, %v442_v53  ;;  %v718_v58 = vpack.c.bf16 %v458_v54, %v458_v54 }
  0xf6   : > { %537 = vst.msk [vmem:[%s920_s9 + $0xc] sm:$0xf] %vm533_vm1, %v716_v55  ;;  %541 = vst.msk [vmem:[%s920_s9 + $0x1c] sm:$0xf] %vm533_vm1, %v720_v56 }
  0xf7   : > { %535 = vst.msk [vmem:[%s920_s9 + $0x4] sm:$0xf] %vm533_vm1, %v714_v57  ;;  %539 = vst.msk [vmem:[%s920_s9 + $0x14] sm:$0xf] %vm533_vm1, %v718_v58  ;;  %v747_v60 = vpop.f32.mrb[4].mxu1 }
  0xf8   : > { %v479_v61 = vadd.f32 %v747_v60, %v348_v59  ;;  %v470_v62 = vpop.f32.mrb[5].mxu1 }
  0xf9   : > { %v471_v0 = vadd.f32 %v470_v62, %v338_v33  ;;  %v748_v1 = vpop.f32.mrb[6].mxu1 }
  0xfa   : > { %v723_v2 = vpack.c.bf16 %v479_v61, %v479_v61  ;;  %v482_v3 = vadd.f32 %v748_v1, %v353_v63  ;;  %v473_v4 = vpop.f32.mrb[7].mxu1 }
  0xfb   : > { %v721_v5 = vpack.c.bf16 %v471_v0, %v471_v0  ;;  %v474_v6 = vadd.f32 %v473_v4, %v343_v50 }
  0xfc   : > { %544 = vst.msk [vmem:[%s920_s9 + $0x28] sm:$0xf] %vm533_vm1, %v723_v2  ;;  %v724_v7 = vpack.c.bf16 %v482_v3, %v482_v3 }
  0xfd   : > { %542 = vst.msk [vmem:[%s920_s9 + $0x20] sm:$0xf] %vm533_vm1, %v721_v5  ;;  %v722_v8 = vpack.c.bf16 %v474_v6, %v474_v6 }
  0xfe   : > { %545 = vst.msk [vmem:[%s920_s9 + $0x2c] sm:$0xf] %vm533_vm1, %v724_v7 }
  0xff   : > { %543 = vst.msk [vmem:[%s920_s9 + $0x24] sm:$0xf] %vm533_vm1, %v722_v8 }
 0x100 PF: > { %s13_s14 = sadd.s32 1, %s809_s14   ;;  %s959_s12 = smov %s805_s13 }
 0x101   : > { %p10_p5 = scmp.ge.s32.totalorder %s13_s14, 4   ;;  %s960_s13 = smov %s962_s15 }
 0x103   :  { %12 = sbr.rel (!%p10_p5) target bundleno = 2 (0x2), region = 68 }

</bundles_post_ra>
